<compile_context>
chip_gen: v6e
topology: v6e:2x2x1
jax: 0.10.0
libtpu: 0.0.40
codegen_flags: <defaults>
</compile_context>

<pallas_src>
import jax
import jax.numpy as jnp
import numpy as np
from jax.experimental import pallas as pl
from jax.experimental.pallas import tpu as pltpu

SLAB_W = 128  # lane width of the packed weight/bias slab


def _ru(x, m):
    return ((x + m - 1) // m) * m


# ---------------------------------------------------------------------------
# One-time host-side lowering: build the packed weight slab + static gather plan
# ---------------------------------------------------------------------------
def prepare_trunk_params(input_shape, batch, conv_params, fc_params):
    C, H, W = input_shape
    N = batch
    assert len(conv_params) >= 1 and len(fc_params) >= 1

    chunks = []          # list of (K_padded, SLAB_W) float32 blocks
    row_off = 0
    layers = []
    bias_list = []       # one (SLAB_W,) bias row per layer, in layer order

    def add_chunk(mat):
        nonlocal row_off
        k, w_ = mat.shape
        assert w_ <= SLAB_W
        blk = np.zeros((_ru(max(k, 1), 8), SLAB_W), np.float32)
        blk[:k, :w_] = mat
        off = row_off
        chunks.append(blk)
        row_off += blk.shape[0]
        return off

    # ----- conv layers -----
    Hin, Win, Cin = H, W, C
    for li, (w, b, stride, pad) in enumerate(conv_params):
        w = np.asarray(w, np.float32)
        b = np.asarray(b, np.float32)
        OC, Cw, kh, kw = w.shape
        assert Cw == Cin
        OH = (Hin + 2 * pad - kh) // stride + 1
        OW = (Win + 2 * pad - kw) // stride + 1
        out_w = OW * OC
        assert out_w <= SLAB_W, "conv output row wider than one lane tile"

        if li == 0:
            # source = raw NCHW reshape (N*C*H, W): rows (n, c, h), lanes w
            groups = [(i, c) for i in range(kh) for c in range(Cin)]
            gwidth = Win
        else:
            # source = previous conv activations (N*H, W*C): rows (n, h), lanes (w, c)
            groups = [(i, None) for i in range(kh)]
            gwidth = Win * Cin

        gathers = []
        for (i, c) in groups:
            per_n = []
            for n in range(N):
                base = (n * Cin * Hin + c * Hin) if li == 0 else (n * Hin)
                hins = [stride * oh + i - pad for oh in range(OH)]
                lead = sum(1 for h_ in hins if h_ < 0)
                trail = sum(1 for h_ in hins if h_ >= Hin)
                nvalid = OH - lead - trail
                start = base + (hins[lead] if nvalid > 0 else 0)
                per_n.append((lead, start, nvalid, stride, trail))
            gathers.append(tuple(per_n))

        K = len(groups) * gwidth
        M = np.zeros((K, out_w), np.float32)
        for gi, (i, c) in enumerate(groups):
            for ow in range(OW):
                for j in range(kw):
                    w_in = stride * ow + j - pad
                    if not (0 <= w_in < Win):
                        continue          # explicit W zero-padding: term absent
                    if li == 0:
                        M[gi * gwidth + w_in, ow * OC:(ow + 1) * OC] = w[:, c, i, j]
                    else:
                        M[gi * gwidth + w_in * Cin:gi * gwidth + (w_in + 1) * Cin,
                          ow * OC:(ow + 1) * OC] = w[:, :, i, j].T

        brow = np.zeros((SLAB_W,), np.float32)
        brow[:out_w] = np.tile(b, OW)
        bias_list.append(brow)

        layers.append(dict(kind="conv", gathers=tuple(gathers), gwidth=gwidth,
                           K=K, out_w=out_w, rows=N * OH, w_off=add_chunk(M)))
        Hin, Win, Cin = OH, OW, OC

    # ----- FC1: BatchFlatten (NCHW order) absorbed into a permuted weight -----
    Hl, Wl, Cl = Hin, Win, Cin
    flat_in = Hl * Wl * Cl
    wf1, bf1 = fc_params[0]
    wf1 = np.asarray(wf1, np.float32)
    bf1 = np.asarray(bf1, np.float32)
    assert wf1.shape[0] == flat_in
    hid = wf1.shape[1]
    assert hid <= SLAB_W
    MF = np.zeros((flat_in, hid), np.float32)
    for oh in range(Hl):
        for ow in range(Wl):
            for c in range(Cl):
                MF[oh * (Wl * Cl) + ow * Cl + c, :] = wf1[c * Hl * Wl + oh * Wl + ow, :]
    brow = np.zeros((SLAB_W,), np.float32)
    brow[:hid] = bf1
    bias_list.append(brow)
    layers.append(dict(kind="fc1", H=Hl, K=flat_in, out_w=hid, w_off=add_chunk(MF)))

    # ----- remaining FC layers: plain dense -----
    prev = hid
    for (wf, bf) in fc_params[1:]:
        wf = np.asarray(wf, np.float32)
        bf = np.asarray(bf, np.float32)
        assert wf.shape[0] == prev and wf.shape[1] <= SLAB_W
        hid = wf.shape[1]
        brow = np.zeros((SLAB_W,), np.float32)
        brow[:hid] = bf
        bias_list.append(brow)
        layers.append(dict(kind="fc", K=prev, out_w=hid, w_off=add_chunk(wf)))
        prev = hid

    # ----- all bias rows as one final chunk (one row per layer) -----
    bias_base = add_chunk(np.stack(bias_list, axis=0))
    for idx, layer in enumerate(layers):
        layer["bias_row"] = bias_base + idx

    slab = jnp.asarray(np.concatenate(chunks, axis=0))

    n_conv = len(conv_params)
    scratch_shapes = tuple((layers[i]["rows"], layers[i]["out_w"])
                           for i in range(n_conv - 1))  # conv outputs feeding a conv
    plan = dict(batch=N, layers=tuple(layers), n_scratch=n_conv - 1,
                scratch_shapes=scratch_shapes,
                in_rows=N * C * H, in_cols=W, out_features=prev)
    return slab, plan


# ---------------------------------------------------------------------------
# Fused trunk kernel (built once per static plan)
# ---------------------------------------------------------------------------
def _make_trunk_kernel(plan):
    N = plan["batch"]
    layers = plan["layers"]
    n_scratch = plan["n_scratch"]

    def kernel(a_ref, w_ref, o_ref, *scratch):
        def wchunk(layer):
            return w_ref[pl.ds(layer["w_off"], layer["K"]), pl.ds(0, layer["out_w"])]

        def brow(layer):
            return w_ref[pl.ds(layer["bias_row"], 1), pl.ds(0, layer["out_w"])]

        def gather_block(src, spec, width):
            lead, start, nvalid, step, trail = spec
            segs = []
            if lead:
                segs.append(jnp.zeros((lead, width), jnp.float32))
            if nvalid:
                if step == 1 or nvalid == 1:
                    segs.append(src[pl.ds(start, nvalid), :])
                else:
                    segs.append(src[pl.ds(start, nvalid, stride=step), :])
            if trail:
                segs.append(jnp.zeros((trail, width), jnp.float32))
            return segs[0] if len(segs) == 1 else jnp.concatenate(segs, axis=0)

        src = a_ref
        conv_idx = 0
        h = None
        for layer in layers:
            kind = layer["kind"]
            if kind == "conv":
                batch_rows = []
                for n in range(N):
                    taps = [gather_block(src, g[n], layer["gwidth"])
                            for g in layer["gathers"]]
                    batch_rows.append(taps[0] if len(taps) == 1
                                      else jnp.concatenate(taps, axis=1))
                x = batch_rows[0] if N == 1 else jnp.concatenate(batch_rows, axis=0)
            elif kind == "fc1":
                Hl = layer["H"]
                rows = []
                for n in range(N):
                    pieces = [h[n * Hl + oh:n * Hl + oh + 1, :] for oh in range(Hl)]
                    rows.append(pieces[0] if Hl == 1
                                else jnp.concatenate(pieces, axis=1))
                x = rows[0] if N == 1 else jnp.concatenate(rows, axis=0)
            else:  # plain fc
                x = h

            h = jnp.maximum(
                jnp.dot(x, wchunk(layer), preferred_element_type=jnp.float32)
                + brow(layer), 0.0)

            if kind == "conv":
                if conv_idx < n_scratch:       # next layer is another conv
                    scratch[conv_idx][...] = h
                    src = scratch[conv_idx]
                conv_idx += 1

        o_ref[...] = h

    return kernel


def build_trunk_forward(plan):
    kernel = _make_trunk_kernel(plan)
    call = pl.pallas_call(
        kernel,
        out_shape=jax.ShapeDtypeStruct((plan["batch"], plan["out_features"]),
                                       jnp.float32),
        scratch_shapes=[pltpu.VMEM(s, jnp.float32) for s in plan["scratch_shapes"]],
    )

    @jax.jit
    def forward(x, slab):
        # x.float() + free row-major NCHW reshape (no transpose, no extra kernel)
        a = x.astype(jnp.float32).reshape(plan["in_rows"], plan["in_cols"])
        return call(a, slab)

    return forward


# ---------------------------------------------------------------------------
# Pure-JAX reference (lax.conv) for the correctness check
# ---------------------------------------------------------------------------
def _reference_forward(x, conv_params, fc_params):
    x = x.astype(jnp.float32)
    for (w, b, stride, padding) in conv_params:
        y = jax.lax.conv_general_dilated(
            x, w, window_strides=(stride, stride),
            padding=[(padding, padding), (padding, padding)],
            dimension_numbers=("NCHW", "OIHW", "NCHW"))
        x = jnp.maximum(y + b[None, :, None, None], 0.0)
    x = x.reshape(x.shape[0], -1)
    for (w, b) in fc_params:
        x = jnp.maximum(x @ w + b, 0.0)
    return x


if __name__ == "__main__":
    # Module config (small, consistent with ConvMLPTrunk.__init__)
    input_shape = (4, 16, 16)        # (C, H, W)
    batch = 2
    conv_out_cs = [8, 16]
    conv_filter_sizes = [3, 3]
    conv_paddings = [1, 1]
    conv_strides = [2, 2]
    fc_hidden_sizes = [32, 32]       # activation = ReLU

    key = jax.random.PRNGKey(0)
    k_in, key = jax.random.split(key)
    x = jax.random.normal(k_in, (batch,) + input_shape, dtype=jnp.float32)

    # Deterministic synthetic parameters (shapes match nn.Conv2d / nn.Linear)
    conv_params = []
    in_c = input_shape[0]
    for oc, ks, pad, st in zip(conv_out_cs, conv_filter_sizes,
                               conv_paddings, conv_strides):
        kw_, kb_, key = jax.random.split(key, 3)
        w = jax.random.normal(kw_, (oc, in_c, ks, ks), dtype=jnp.float32) * 0.1
        b = jax.random.normal(kb_, (oc,), dtype=jnp.float32) * 0.1
        conv_params.append((w, b, st, pad))
        in_c = oc

    # Conv output shape: 16 -> 8 -> 4 spatially, channels 16  => flat 16*4*4 = 256
    h_sp = w_sp = input_shape[1]
    for ks, pad, st in zip(conv_filter_sizes, conv_paddings, conv_strides):
        h_sp = (h_sp + 2 * pad - ks) // st + 1
        w_sp = (w_sp + 2 * pad - ks) // st + 1
    flat_in = conv_out_cs[-1] * h_sp * w_sp

    fc_params = []
    d_in = flat_in
    for hdim in fc_hidden_sizes:
        kw_, kb_, key = jax.random.split(key, 3)
        w = jax.random.normal(kw_, (d_in, hdim), dtype=jnp.float32) * 0.05
        b = jax.random.normal(kb_, (hdim,), dtype=jnp.float32) * 0.05
        fc_params.append((w, b))
        d_in = hdim

    # One-time host-side lowering (im2col folding, flatten order, padding, packing)
    slab, plan = prepare_trunk_params(input_shape, batch, conv_params, fc_params)
    forward = build_trunk_forward(plan)

    out = jax.block_until_ready(forward(x, slab))
    ref = jax.block_until_ready(_reference_forward(x, conv_params, fc_params))

    np.testing.assert_allclose(np.asarray(out), np.asarray(ref),
                               rtol=1e-4, atol=1e-4)
    assert out.shape == (batch, fc_hidden_sizes[-1])
    print("KERNEL_OK")
</pallas_src>

<mosaic_0001>
module attributes {stable_mosaic.version = 11 : i64} {
  func.func @kernel(%arg0: memref<128x16xf32, #tpu.memory_space<vmem>>, %arg1: memref<680x128xf32, #tpu.memory_space<vmem>>, %arg2: memref<2x32xf32, #tpu.memory_space<vmem>>, %arg3: memref<16x64xf32, #tpu.memory_space<vmem>>) attributes {dimension_semantics = [], scalar_prefetch = 0 : i64, scratch_operands = 1 : i64, tpu.core_type = #tpu.core_type<tc>} {
    %cst = arith.constant 0.000000e+00 : f32
    %0 = vector.broadcast %cst : f32 to vector<1x16xf32>
    %c1 = arith.constant 1 : index
    %c0 = arith.constant 0 : index
    %1 = tpu.strided_load %arg0[%c1, %c0] {strides = array<i32: 2, 1>} : memref<128x16xf32, #tpu.memory_space<vmem>>, vector<7x16xf32>
    %2 = tpu.concatenate %0, %1 in 0 : vector<1x16xf32>, vector<7x16xf32> -> vector<8x16xf32>
    %cst_0 = arith.constant 0.000000e+00 : f32
    %3 = vector.broadcast %cst_0 : f32 to vector<1x16xf32>
    %c17 = arith.constant 17 : index
    %c0_1 = arith.constant 0 : index
    %4 = tpu.strided_load %arg0[%c17, %c0_1] {strides = array<i32: 2, 1>} : memref<128x16xf32, #tpu.memory_space<vmem>>, vector<7x16xf32>
    %5 = tpu.concatenate %3, %4 in 0 : vector<1x16xf32>, vector<7x16xf32> -> vector<8x16xf32>
    %cst_2 = arith.constant 0.000000e+00 : f32
    %6 = vector.broadcast %cst_2 : f32 to vector<1x16xf32>
    %c33 = arith.constant 33 : index
    %c0_3 = arith.constant 0 : index
    %7 = tpu.strided_load %arg0[%c33, %c0_3] {strides = array<i32: 2, 1>} : memref<128x16xf32, #tpu.memory_space<vmem>>, vector<7x16xf32>
    %8 = tpu.concatenate %6, %7 in 0 : vector<1x16xf32>, vector<7x16xf32> -> vector<8x16xf32>
    %cst_4 = arith.constant 0.000000e+00 : f32
    %9 = vector.broadcast %cst_4 : f32 to vector<1x16xf32>
    %c49 = arith.constant 49 : index
    %c0_5 = arith.constant 0 : index
    %10 = tpu.strided_load %arg0[%c49, %c0_5] {strides = array<i32: 2, 1>} : memref<128x16xf32, #tpu.memory_space<vmem>>, vector<7x16xf32>
    %11 = tpu.concatenate %9, %10 in 0 : vector<1x16xf32>, vector<7x16xf32> -> vector<8x16xf32>
    %c0_6 = arith.constant 0 : index
    %c0_7 = arith.constant 0 : index
    %12 = tpu.strided_load %arg0[%c0_6, %c0_7] {strides = array<i32: 2, 1>} : memref<128x16xf32, #tpu.memory_space<vmem>>, vector<8x16xf32>
    %c16 = arith.constant 16 : index
    %c0_8 = arith.constant 0 : index
    %13 = tpu.strided_load %arg0[%c16, %c0_8] {strides = array<i32: 2, 1>} : memref<128x16xf32, #tpu.memory_space<vmem>>, vector<8x16xf32>
    %c32 = arith.constant 32 : index
    %c0_9 = arith.constant 0 : index
    %14 = tpu.strided_load %arg0[%c32, %c0_9] {strides = array<i32: 2, 1>} : memref<128x16xf32, #tpu.memory_space<vmem>>, vector<8x16xf32>
    %c48 = arith.constant 48 : index
    %c0_10 = arith.constant 0 : index
    %15 = tpu.strided_load %arg0[%c48, %c0_10] {strides = array<i32: 2, 1>} : memref<128x16xf32, #tpu.memory_space<vmem>>, vector<8x16xf32>
    %c1_11 = arith.constant 1 : index
    %c0_12 = arith.constant 0 : index
    %16 = tpu.strided_load %arg0[%c1_11, %c0_12] {strides = array<i32: 2, 1>} : memref<128x16xf32, #tpu.memory_space<vmem>>, vector<8x16xf32>
    %c17_13 = arith.constant 17 : index
    %c0_14 = arith.constant 0 : index
    %17 = tpu.strided_load %arg0[%c17_13, %c0_14] {strides = array<i32: 2, 1>} : memref<128x16xf32, #tpu.memory_space<vmem>>, vector<8x16xf32>
    %c33_15 = arith.constant 33 : index
    %c0_16 = arith.constant 0 : index
    %18 = tpu.strided_load %arg0[%c33_15, %c0_16] {strides = array<i32: 2, 1>} : memref<128x16xf32, #tpu.memory_space<vmem>>, vector<8x16xf32>
    %c49_17 = arith.constant 49 : index
    %c0_18 = arith.constant 0 : index
    %19 = tpu.strided_load %arg0[%c49_17, %c0_18] {strides = array<i32: 2, 1>} : memref<128x16xf32, #tpu.memory_space<vmem>>, vector<8x16xf32>
    %20 = tpu.concatenate %2, %5, %8, %11, %12, %13, %14, %15, %16, %17, %18, %19 in 1 : vector<8x16xf32>, vector<8x16xf32>, vector<8x16xf32>, vector<8x16xf32>, vector<8x16xf32>, vector<8x16xf32>, vector<8x16xf32>, vector<8x16xf32>, vector<8x16xf32>, vector<8x16xf32>, vector<8x16xf32>, vector<8x16xf32> -> vector<8x192xf32>
    %cst_19 = arith.constant 0.000000e+00 : f32
    %21 = vector.broadcast %cst_19 : f32 to vector<1x16xf32>
    %c65 = arith.constant 65 : index
    %c0_20 = arith.constant 0 : index
    %22 = tpu.strided_load %arg0[%c65, %c0_20] {strides = array<i32: 2, 1>} : memref<128x16xf32, #tpu.memory_space<vmem>>, vector<7x16xf32>
    %23 = tpu.concatenate %21, %22 in 0 : vector<1x16xf32>, vector<7x16xf32> -> vector<8x16xf32>
    %cst_21 = arith.constant 0.000000e+00 : f32
    %24 = vector.broadcast %cst_21 : f32 to vector<1x16xf32>
    %c81 = arith.constant 81 : index
    %c0_22 = arith.constant 0 : index
    %25 = tpu.strided_load %arg0[%c81, %c0_22] {strides = array<i32: 2, 1>} : memref<128x16xf32, #tpu.memory_space<vmem>>, vector<7x16xf32>
    %26 = tpu.concatenate %24, %25 in 0 : vector<1x16xf32>, vector<7x16xf32> -> vector<8x16xf32>
    %cst_23 = arith.constant 0.000000e+00 : f32
    %27 = vector.broadcast %cst_23 : f32 to vector<1x16xf32>
    %c97 = arith.constant 97 : index
    %c0_24 = arith.constant 0 : index
    %28 = tpu.strided_load %arg0[%c97, %c0_24] {strides = array<i32: 2, 1>} : memref<128x16xf32, #tpu.memory_space<vmem>>, vector<7x16xf32>
    %29 = tpu.concatenate %27, %28 in 0 : vector<1x16xf32>, vector<7x16xf32> -> vector<8x16xf32>
    %cst_25 = arith.constant 0.000000e+00 : f32
    %30 = vector.broadcast %cst_25 : f32 to vector<1x16xf32>
    %c113 = arith.constant 113 : index
    %c0_26 = arith.constant 0 : index
    %31 = tpu.strided_load %arg0[%c113, %c0_26] {strides = array<i32: 2, 1>} : memref<128x16xf32, #tpu.memory_space<vmem>>, vector<7x16xf32>
    %32 = tpu.concatenate %30, %31 in 0 : vector<1x16xf32>, vector<7x16xf32> -> vector<8x16xf32>
    %c64 = arith.constant 64 : index
    %c0_27 = arith.constant 0 : index
    %33 = tpu.strided_load %arg0[%c64, %c0_27] {strides = array<i32: 2, 1>} : memref<128x16xf32, #tpu.memory_space<vmem>>, vector<8x16xf32>
    %c80 = arith.constant 80 : index
    %c0_28 = arith.constant 0 : index
    %34 = tpu.strided_load %arg0[%c80, %c0_28] {strides = array<i32: 2, 1>} : memref<128x16xf32, #tpu.memory_space<vmem>>, vector<8x16xf32>
    %c96 = arith.constant 96 : index
    %c0_29 = arith.constant 0 : index
    %35 = tpu.strided_load %arg0[%c96, %c0_29] {strides = array<i32: 2, 1>} : memref<128x16xf32, #tpu.memory_space<vmem>>, vector<8x16xf32>
    %c112 = arith.constant 112 : index
    %c0_30 = arith.constant 0 : index
    %36 = tpu.strided_load %arg0[%c112, %c0_30] {strides = array<i32: 2, 1>} : memref<128x16xf32, #tpu.memory_space<vmem>>, vector<8x16xf32>
    %c65_31 = arith.constant 65 : index
    %c0_32 = arith.constant 0 : index
    %37 = tpu.strided_load %arg0[%c65_31, %c0_32] {strides = array<i32: 2, 1>} : memref<128x16xf32, #tpu.memory_space<vmem>>, vector<8x16xf32>
    %c81_33 = arith.constant 81 : index
    %c0_34 = arith.constant 0 : index
    %38 = tpu.strided_load %arg0[%c81_33, %c0_34] {strides = array<i32: 2, 1>} : memref<128x16xf32, #tpu.memory_space<vmem>>, vector<8x16xf32>
    %c97_35 = arith.constant 97 : index
    %c0_36 = arith.constant 0 : index
    %39 = tpu.strided_load %arg0[%c97_35, %c0_36] {strides = array<i32: 2, 1>} : memref<128x16xf32, #tpu.memory_space<vmem>>, vector<8x16xf32>
    %c113_37 = arith.constant 113 : index
    %c0_38 = arith.constant 0 : index
    %40 = tpu.strided_load %arg0[%c113_37, %c0_38] {strides = array<i32: 2, 1>} : memref<128x16xf32, #tpu.memory_space<vmem>>, vector<8x16xf32>
    %41 = tpu.concatenate %23, %26, %29, %32, %33, %34, %35, %36, %37, %38, %39, %40 in 1 : vector<8x16xf32>, vector<8x16xf32>, vector<8x16xf32>, vector<8x16xf32>, vector<8x16xf32>, vector<8x16xf32>, vector<8x16xf32>, vector<8x16xf32>, vector<8x16xf32>, vector<8x16xf32>, vector<8x16xf32>, vector<8x16xf32> -> vector<8x192xf32>
    %42 = tpu.concatenate %20, %41 in 0 : vector<8x192xf32>, vector<8x192xf32> -> vector<16x192xf32>
    %c0_39 = arith.constant 0 : index
    %c0_40 = arith.constant 0 : index
    %43 = vector.load %arg1[%c0_39, %c0_40] : memref<680x128xf32, #tpu.memory_space<vmem>>, vector<192x64xf32>
    %cst_41 = arith.constant dense<0.000000e+00> : vector<16x64xf32>
    %44 = tpu.matmul %42, %43, %cst_41 {dimension_numbers = #tpu.dot_dimension_numbers<[1], [0], [0], [1], [0, 0, 1, 1], [], []>} : vector<16x192xf32>, vector<192x64xf32>, vector<16x64xf32> -> vector<16x64xf32>
    %c672 = arith.constant 672 : index
    %c0_42 = arith.constant 0 : index
    %45 = vector.load %arg1[%c672, %c0_42] : memref<680x128xf32, #tpu.memory_space<vmem>>, vector<1x64xf32>
    %46 = vector.broadcast %45 : vector<1x64xf32> to vector<16x64xf32>
    %47 = arith.addf %44, %46 : vector<16x64xf32>
    %cst_43 = arith.constant 0.000000e+00 : f32
    %48 = vector.broadcast %cst_43 : f32 to vector<16x64xf32>
    %49 = arith.maximumf %47, %48 : vector<16x64xf32>
    %c0_44 = arith.constant 0 : index
    %c0_45 = arith.constant 0 : index
    %50 = vector.load %arg3[%c0_44, %c0_45] : memref<16x64xf32, #tpu.memory_space<vmem>>, vector<16x64xf32>
    tpu.vector_store %arg3[%c0_44, %c0_45], %49 {strides = array<i32>} : memref<16x64xf32, #tpu.memory_space<vmem>>, vector<16x64xf32>,
    %cst_46 = arith.constant 0.000000e+00 : f32
    %51 = vector.broadcast %cst_46 : f32 to vector<1x64xf32>
    %c1_47 = arith.constant 1 : index
    %c0_48 = arith.constant 0 : index
    %52 = tpu.strided_load %arg3[%c1_47, %c0_48] {strides = array<i32: 2, 1>} : memref<16x64xf32, #tpu.memory_space<vmem>>, vector<3x64xf32>
    %53 = tpu.concatenate %51, %52 in 0 : vector<1x64xf32>, vector<3x64xf32> -> vector<4x64xf32>
    %c0_49 = arith.constant 0 : index
    %c0_50 = arith.constant 0 : index
    %54 = tpu.strided_load %arg3[%c0_49, %c0_50] {strides = array<i32: 2, 1>} : memref<16x64xf32, #tpu.memory_space<vmem>>, vector<4x64xf32>
    %c1_51 = arith.constant 1 : index
    %c0_52 = arith.constant 0 : index
    %55 = tpu.strided_load %arg3[%c1_51, %c0_52] {strides = array<i32: 2, 1>} : memref<16x64xf32, #tpu.memory_space<vmem>>, vector<4x64xf32>
    %56 = tpu.concatenate %53, %54, %55 in 1 : vector<4x64xf32>, vector<4x64xf32>, vector<4x64xf32> -> vector<4x192xf32>
    %cst_53 = arith.constant 0.000000e+00 : f32
    %57 = vector.broadcast %cst_53 : f32 to vector<1x64xf32>
    %c9 = arith.constant 9 : index
    %c0_54 = arith.constant 0 : index
    %58 = tpu.strided_load %arg3[%c9, %c0_54] {strides = array<i32: 2, 1>} : memref<16x64xf32, #tpu.memory_space<vmem>>, vector<3x64xf32>
    %59 = tpu.concatenate %57, %58 in 0 : vector<1x64xf32>, vector<3x64xf32> -> vector<4x64xf32>
    %c8 = arith.constant 8 : index
    %c0_55 = arith.constant 0 : index
    %60 = tpu.strided_load %arg3[%c8, %c0_55] {strides = array<i32: 2, 1>} : memref<16x64xf32, #tpu.memory_space<vmem>>, vector<4x64xf32>
    %c9_56 = arith.constant 9 : index
    %c0_57 = arith.constant 0 : index
    %61 = tpu.strided_load %arg3[%c9_56, %c0_57] {strides = array<i32: 2, 1>} : memref<16x64xf32, #tpu.memory_space<vmem>>, vector<4x64xf32>
    %62 = tpu.concatenate %59, %60, %61 in 1 : vector<4x64xf32>, vector<4x64xf32>, vector<4x64xf32> -> vector<4x192xf32>
    %63 = tpu.concatenate %56, %62 in 0 : vector<4x192xf32>, vector<4x192xf32> -> vector<8x192xf32>
    %c192 = arith.constant 192 : index
    %c0_58 = arith.constant 0 : index
    %64 = vector.load %arg1[%c192, %c0_58] : memref<680x128xf32, #tpu.memory_space<vmem>>, vector<192x64xf32>
    %cst_59 = arith.constant dense<0.000000e+00> : vector<8x64xf32>
    %65 = tpu.matmul %63, %64, %cst_59 {dimension_numbers = #tpu.dot_dimension_numbers<[1], [0], [0], [1], [0, 0, 1, 1], [], []>} : vector<8x192xf32>, vector<192x64xf32>, vector<8x64xf32> -> vector<8x64xf32>
    %c673 = arith.constant 673 : index
    %c0_60 = arith.constant 0 : index
    %66 = vector.load %arg1[%c673, %c0_60] : memref<680x128xf32, #tpu.memory_space<vmem>>, vector<1x64xf32>
    %67 = vector.broadcast %66 : vector<1x64xf32> to vector<8x64xf32>
    %68 = arith.addf %65, %67 : vector<8x64xf32>
    %cst_61 = arith.constant 0.000000e+00 : f32
    %69 = vector.broadcast %cst_61 : f32 to vector<8x64xf32>
    %70 = arith.maximumf %68, %69 : vector<8x64xf32>
    %71 = vector.extract_strided_slice %70 {offsets = [0, 0], sizes = [1, 64], strides = [1, 1]} : vector<8x64xf32> to vector<1x64xf32>
    %72 = vector.extract_strided_slice %70 {offsets = [1, 0], sizes = [1, 64], strides = [1, 1]} : vector<8x64xf32> to vector<1x64xf32>
    %73 = vector.extract_strided_slice %70 {offsets = [2, 0], sizes = [1, 64], strides = [1, 1]} : vector<8x64xf32> to vector<1x64xf32>
    %74 = vector.extract_strided_slice %70 {offsets = [3, 0], sizes = [1, 64], strides = [1, 1]} : vector<8x64xf32> to vector<1x64xf32>
    %75 = tpu.concatenate %71, %72, %73, %74 in 1 : vector<1x64xf32>, vector<1x64xf32>, vector<1x64xf32>, vector<1x64xf32> -> vector<1x256xf32>
    %76 = vector.extract_strided_slice %70 {offsets = [4, 0], sizes = [1, 64], strides = [1, 1]} : vector<8x64xf32> to vector<1x64xf32>
    %77 = vector.extract_strided_slice %70 {offsets = [5, 0], sizes = [1, 64], strides = [1, 1]} : vector<8x64xf32> to vector<1x64xf32>
    %78 = vector.extract_strided_slice %70 {offsets = [6, 0], sizes = [1, 64], strides = [1, 1]} : vector<8x64xf32> to vector<1x64xf32>
    %79 = vector.extract_strided_slice %70 {offsets = [7, 0], sizes = [1, 64], strides = [1, 1]} : vector<8x64xf32> to vector<1x64xf32>
    %80 = tpu.concatenate %76, %77, %78, %79 in 1 : vector<1x64xf32>, vector<1x64xf32>, vector<1x64xf32>, vector<1x64xf32> -> vector<1x256xf32>
    %81 = tpu.concatenate %75, %80 in 0 : vector<1x256xf32>, vector<1x256xf32> -> vector<2x256xf32>
    %c384 = arith.constant 384 : index
    %c0_62 = arith.constant 0 : index
    %82 = vector.load %arg1[%c384, %c0_62] : memref<680x128xf32, #tpu.memory_space<vmem>>, vector<256x32xf32>
    %cst_63 = arith.constant dense<0.000000e+00> : vector<2x32xf32>
    %83 = tpu.matmul %81, %82, %cst_63 {dimension_numbers = #tpu.dot_dimension_numbers<[1], [0], [0], [1], [0, 0, 1, 1], [], []>} : vector<2x256xf32>, vector<256x32xf32>, vector<2x32xf32> -> vector<2x32xf32>
    %c674 = arith.constant 674 : index
    %c0_64 = arith.constant 0 : index
    %84 = vector.load %arg1[%c674, %c0_64] : memref<680x128xf32, #tpu.memory_space<vmem>>, vector<1x32xf32>
    %85 = vector.broadcast %84 : vector<1x32xf32> to vector<2x32xf32>
    %86 = arith.addf %83, %85 : vector<2x32xf32>
    %cst_65 = arith.constant 0.000000e+00 : f32
    %87 = vector.broadcast %cst_65 : f32 to vector<2x32xf32>
    %88 = arith.maximumf %86, %87 : vector<2x32xf32>
    %c640 = arith.constant 640 : index
    %c0_66 = arith.constant 0 : index
    %89 = vector.load %arg1[%c640, %c0_66] : memref<680x128xf32, #tpu.memory_space<vmem>>, vector<32x32xf32>
    %cst_67 = arith.constant dense<0.000000e+00> : vector<2x32xf32>
    %90 = tpu.matmul %88, %89, %cst_67 {dimension_numbers = #tpu.dot_dimension_numbers<[1], [0], [0], [1], [0, 0, 1, 1], [], []>} : vector<2x32xf32>, vector<32x32xf32>, vector<2x32xf32> -> vector<2x32xf32>
    %c675 = arith.constant 675 : index
    %c0_68 = arith.constant 0 : index
    %91 = vector.load %arg1[%c675, %c0_68] : memref<680x128xf32, #tpu.memory_space<vmem>>, vector<1x32xf32>
    %92 = vector.broadcast %91 : vector<1x32xf32> to vector<2x32xf32>
    %93 = arith.addf %90, %92 : vector<2x32xf32>
    %cst_69 = arith.constant 0.000000e+00 : f32
    %94 = vector.broadcast %cst_69 : f32 to vector<2x32xf32>
    %95 = arith.maximumf %93, %94 : vector<2x32xf32>
    %c0_70 = arith.constant 0 : index
    %c0_71 = arith.constant 0 : index
    %96 = vector.load %arg2[%c0_70, %c0_71] : memref<2x32xf32, #tpu.memory_space<vmem>>, vector<2x32xf32>
    tpu.vector_store %arg2[%c0_70, %c0_71], %95 {strides = array<i32>} : memref<2x32xf32, #tpu.memory_space<vmem>>, vector<2x32xf32>,
    return
  }
}

</mosaic_0001>

<bundles_post_ra>
// kernel: forward.1
= control target key start
LH: loop header
LB: loop body
LE: loop exit
PB: predicated region body
PF: predicated region fallthrough
CT: control target
= control target key end

     0   :  { %7 = vsyncpa [#allocation4], 0  ;;  %s1024_s0 = inlined_call_operand.hbm [shape: f32[128,16], index: 0, kind: input, shape index: {}]   ;;  %s1025_s1 = inlined_call_operand.hbm [shape: f32[680,128], index: 1, kind: input, shape index: {}]   ;;  %s1026_s2 = inlined_call_operand.hbm [shape: f32[2,32], index: 2, kind: output, shape index: {}]  }
   0x1   :  { %8 = vsyncpa [#allocation7], 0 }
   0x2   :  { %9 = vsyncpa [#allocation5], 0  ;;  %s876_s9 = smov [#allocation3]  }
   0x3   :  { %s15_s10 = sshll.u32 %s876_s9, 4  ;;  %s16_s10 = int_to_ptr.vmem [resolvable:$true] %s15_s10 }
   0x4   :  { %s818_s11 = scalar_lea.vmem %s16_s10, 2048  ;;  %p823_p1 = scmp.lt.s32.totalorder %s16_s10, %s16_s10 }
   0x5   :  { %p819_p0 = scmp.ne.s32.totalorder %s16_s10, %s818_s11  ;;  %p824_p2 = scmp.lt.s32.totalorder %s818_s11, %s818_s11 }
   0x7   :  { %p825_p3 = por %p824_p2, %p823_p1 }
   0x9   :  { %p826_p4 = pnand %p825_p3, %p819_p0 }
   0xb   :  { %829 = shalt.err (!%p826_p4)
}
   0xc   :  { %s877_s12 = smov 128   ;;  %s878_s13 = smov 8  }
   0xd   :  { %21 = dma.hbm_to_vmem [thread:$0]  %s1024_s0, 2048, %s16_s10, [#allocation4], %s877_s12, %s877_s12, %s878_s13  }
   0xe   :  { %s879_s16 = smov [#allocation6]  }
   0xf   :  { %s27_s17 = sshll.u32 %s879_s16, 4  ;;  %s28_s17 = int_to_ptr.vmem [resolvable:$true] %s27_s17 }
  0x10   :  { %s838_s18 = scalar_lea.vmem %s28_s17, 10880  ;;  %p843_p6 = scmp.lt.s32.totalorder %s28_s17, %s28_s17 }
  0x11   :  { %p839_p5 = scmp.ne.s32.totalorder %s28_s17, %s838_s18  ;;  %p844_p7 = scmp.lt.s32.totalorder %s838_s18, %s838_s18 }
  0x13   :  { %p845_p8 = por %p844_p7, %p843_p6 }
  0x15   :  { %p846_p9 = pnand %p845_p8, %p839_p5 }
  0x17   :  { %849 = shalt.err (!%p846_p9)
}
  0x18   :  { %33 = dma.hbm_to_vmem [thread:$0]  %s1025_s1, 10880, %s28_s17, [#allocation7], %s877_s12, %s877_s12, %s878_s13  }
  0x19   :  { %870 = dma.done.wait [#allocation4], 2048  }
  0x1a   :  { %871 = vsyncadd [#allocation4], 4294965248 }
  0x1b   :  { %872 = dma.done.wait [#allocation7], 10880  }
  0x1c   :  { %873 = vsyncadd [#allocation7], 4294956416  ;;  %v880_v0 = vmov 0.0   ;;  %vm45_vm0 = vcmask 1040384   ;;  %v73_v1 = vld [vmem:[#allocation3 + $0x11] ss:$2 sm:$0xff] }
  0x1d   :  { %254 = vmatprep.subr.mxu0 %v880_v0  ;;  %401 = vmatprep.subr.mxu1 %v880_v0  ;;  %v65_v2 = vld [vmem:[#allocation3] ss:$2 sm:$0xff]  ;;  %s881_s0 = smov 16   ;;  %v48_v5 = vld [vmem:[#allocation3 + $0x11] ss:$2 sm:$0x7f] }
  0x1e   :  { %v158_v3 = vld [vmem:[#allocation3 + $0x40] ss:$2 sm:$0xff]  ;;  %105 = vrot.lane.b32.xlu0 %v73_v1, %s881_s0  ;;  %v140_v6 = vld [vmem:[#allocation3 + $0x51] ss:$2 sm:$0x7f]  ;;  %v50_v7 = vrot.slane %v48_v5, 7 }
  0x1f   :  { %v775_v4 = vpack.i.bf16 %v158_v3, %v65_v2  ;;  %v142_v8 = vrot.slane %v140_v6, 7  ;;  %v67_v9 = vld [vmem:[#allocation3 + $0x10] ss:$2 sm:$0xff]  ;;  %s882_s1 = smov 64   ;;  %s883_s21 = smov 80   ;;  %v232_v35 = vld [vmem:[#allocation6 + $0x68] sm:$0xff] }
  0x20   :  { %v160_v10 = vld [vmem:[#allocation3 + $0x50] ss:$2 sm:$0xff]  ;;  %v54_v12 = vld [vmem:[#allocation3 + $0x21] ss:$2 sm:$0x7f]  ;;  %v52_v14 = vsel %vm45_vm0, 0.0, %v50_v7 }
  0x21   :  { %776 = vrot.lane.b32.xlu1 %v775_v4, %s882_s1  ;;  %v780_v11 = vpack.i.bf16 %v160_v10, %v67_v9  ;;  %v146_v13 = vld [vmem:[#allocation3 + $0x61] ss:$2 sm:$0x7f]  ;;  %v144_v15 = vsel %vm45_vm0, 0.0, %v142_v8  ;;  %v56_v16 = vrot.slane %v54_v12, 7  ;;  %v234_v31 = vld [vmem:[#allocation6 + $0x78] sm:$0xff] }
  0x22   :  { %v148_v17 = vrot.slane %v146_v13, 7  ;;  %v785_v18 = vpack.i.bf16 %v144_v15, %v52_v14  ;;  %v60_v19 = vld [vmem:[#allocation3 + $0x31] ss:$2 sm:$0x7f]  ;;  %v69_v28 = vld [vmem:[#allocation3 + $0x20] ss:$2 sm:$0xff]  ;;  %255 = vmatpush1.msra.mxu0 %v234_v31 }
  0x23   :  { %v152_v20 = vld [vmem:[#allocation3 + $0x71] ss:$2 sm:$0x7f]  ;;  %v58_v21 = vsel %vm45_vm0, 0.0, %v56_v16  ;;  %v62_v23 = vrot.slane %v60_v19, 7  ;;  %s884_s22 = smov 32   ;;  %256 = vmatprep.subr.mxu0 %v880_v0 }
  0x24   :  { %v150_v22 = vsel %vm45_vm0, 0.0, %v148_v17  ;;  %v154_v24 = vrot.slane %v152_v20, 7  ;;  %786 = vrot.lane.b32.xlu0 %v785_v18, %s881_s0  ;;  %v162_v29 = vld [vmem:[#allocation3 + $0x60] ss:$2 sm:$0xff]  ;;  %v233_v32 = vld [vmem:[#allocation6 + $0x70] sm:$0xff]  ;;  %s885_s23 = smov 48  }
  0x25   :  { %781 = vrot.lane.b32.xlu1 %v780_v11, %s883_s21  ;;  %v790_v25 = vpack.i.bf16 %v150_v22, %v58_v21  ;;  %v64_v26 = vsel %vm45_vm0, 0.0, %v62_v23  ;;  %v800_v33 = vpack.i.bf16 %v162_v29, %v69_v28  ;;  %v74_v34 = vld [vmem:[#allocation3 + $0x21] ss:$2 sm:$0xff]  ;;  %257 = vmatpush1.msra.mxu0 %v233_v32  ;;  %s886_s24 = smov 96   ;;  %v75_v37 = vld [vmem:[#allocation3 + $0x31] ss:$2 sm:$0xff] }
  0x26   :  { %v156_v27 = vsel %vm45_vm0, 0.0, %v154_v24  ;;  %258 = vmatprep.subr.mxu0 %v880_v0  ;;  %v231_v36 = vld [vmem:[#allocation6 + $0x60] sm:$0xff]  ;;  %v71_v38 = vld [vmem:[#allocation3 + $0x30] ss:$2 sm:$0xff]  ;;  %s887_s25 = smov 112   ;;  %v228_v43 = vld [vmem:[#allocation6 + $0x48] sm:$0xff] }
  0x27   :  { %v795_v30 = vpack.i.bf16 %v156_v27, %v64_v26  ;;  %259 = vmatpush1.msra.mxu0 %v232_v35  ;;  %v230_v39 = vld [vmem:[#allocation6 + $0x58] sm:$0xff]  ;;  %v167_v41 = vld [vmem:[#allocation3 + $0x61] ss:$2 sm:$0xff]  ;;  %v229_v42 = vld [vmem:[#allocation6 + $0x50] sm:$0xff]  ;;  %vm116_vm1 = vcmask 130048   ;;  %vm118_vm2 = vcmask 261120  }
  0x28   :  { %791 = vrot.lane.b32.xlu0 %v790_v25, %s884_s22  ;;  %260 = vmatprep.subr.mxu0 %v880_v0  ;;  %v166_v40 = vld [vmem:[#allocation3 + $0x51] ss:$2 sm:$0xff]  ;;  %v164_v45 = vld [vmem:[#allocation3 + $0x70] ss:$2 sm:$0xff]  ;;  %v227_v46 = vld [vmem:[#allocation6 + $0x40] sm:$0xff]  ;;  %vm120_vm3 = vcmask 392192  }
  0x29   :  { %796 = vrot.lane.b32.xlu1 %v795_v30, %s885_s23  ;;  %261 = vmatpush1.msra.mxu0 %v231_v36  ;;  %v168_v44 = vld [vmem:[#allocation3 + $0x71] ss:$2 sm:$0xff]  ;;  %v224_v49 = vld [vmem:[#allocation6 + $0x28] sm:$0xff]  ;;  %v223_v50 = vld [vmem:[#allocation6 + $0x20] sm:$0xff]  ;;  %vm122_vm4 = vcmask 523264   ;;  %vm124_vm5 = vcmask 654336  }
  0x2a   :  { %262 = vmatprep.subr.mxu0 %v880_v0  ;;  %v226_v47 = vld [vmem:[#allocation6 + $0x38] sm:$0xff]  ;;  %v225_v48 = vld [vmem:[#allocation6 + $0x30] sm:$0xff]  ;;  %v220_v53 = vld [vmem:[#allocation6 + $0x8] sm:$0xff]  ;;  %vm126_vm6 = vcmask 785408   ;;  %vm128_vm7 = vcmask 916480   ;;  %vm366_vm8 = vcmask 1043456  }
  0x2b   :  { %263 = vmatpush1.msra.mxu0 %v230_v39  ;;  %v222_v51 = vld [vmem:[#allocation6 + $0x18] sm:$0xff]  ;;  %v221_v52 = vld [vmem:[#allocation6 + $0x10] sm:$0xff]  ;;  %v219_v54 = vld [vmem:[#allocation6] sm:$0xff]  ;;  %vm888_vm9 = vmmov 0   ;;  %s889_s26 = smov [#allocation8]   ;;  %vm684_vm10 = vcmask 254976  }
  0x2c   :  { %109 = vrot.lane.b32.xlu0 %v74_v34, %s884_s22  ;;  %264 = vmatprep.subr.mxu0 %v880_v0  ;;  %v242_v55 = vld [vmem:[#allocation6 + $0xb8] sm:$0xff]  ;;  %v241_v56 = vld [vmem:[#allocation6 + $0xb0] sm:$0xff]  ;;  %v240_v57 = vld [vmem:[#allocation6 + $0xa8] sm:$0xff]  ;;  %s692_s27 = sshll.u32 %s889_s26, 4  ;;  %s693_s27 = int_to_ptr.vmem [resolvable:$true] %s692_s27 }
  0x2d   :  { %801 = vrot.lane.b32.xlu1 %v800_v33, %s886_s24  ;;  %265 = vmatpush1.msra.mxu0 %v229_v42  ;;  %v239_v58 = vld [vmem:[#allocation6 + $0xa0] sm:$0xff]  ;;  %v238_v59 = vld [vmem:[#allocation6 + $0x98] sm:$0xff]  ;;  %v237_v60 = vld [vmem:[#allocation6 + $0x90] sm:$0xff]  ;;  %s850_s28 = scalar_lea.vmem %s693_s27, 32  ;;  %p855_p11 = scmp.lt.s32.totalorder %s693_s27, %s693_s27 }
  0x2e   :  { %266 = vmatprep.subr.mxu0 %v880_v0  ;;  %v236_v61 = vld [vmem:[#allocation6 + $0x88] sm:$0xff]  ;;  %v235_v62 = vld [vmem:[#allocation6 + $0x80] sm:$0xff]  ;;  %p851_p10 = scmp.ne.s32.totalorder %s693_s27, %s850_s28  ;;  %p856_p12 = scmp.lt.s32.totalorder %s850_s28, %s850_s28 }
  0x2f   :  { %267 = vmatpush1.msra.mxu0 %v228_v43  ;;  %v41_v2 = vld [vmem:[#allocation3 + $0x1] ss:$2 sm:$0x7f] }
  0x30   :  { %113 = vrot.lane.b32.xlu0 %v75_v37, %s885_s23  ;;  %268 = vmatprep.subr.mxu0 %v880_v0  ;;  %v134_v3 = vld [vmem:[#allocation3 + $0x41] ss:$2 sm:$0x7f]  ;;  %v43_v4 = vrot.slane %v41_v2, 7  ;;  %p857_p13 = por %p856_p12, %p855_p11 }
  0x31   :  { %101 = vrot.lane.b32.xlu1 %v71_v38, %s887_s25  ;;  %269 = vmatpush1.msra.mxu0 %v227_v46  ;;  %v136_v5 = vrot.slane %v134_v3, 7  ;;  %v72_v22 = vld [vmem:[#allocation3 + $0x1] ss:$2 sm:$0xff]  ;;  %v372_v3 = vld [vmem:[#allocation6 + $0xd8] sm:$0xff] }
  0x32   :  { %270 = vmatprep.subr.mxu0 %v880_v0  ;;  %v46_v10 = vsel %vm45_vm0, 0.0, %v43_v4  ;;  %v373_v2 = vld [vmem:[#allocation6 + $0xe0] sm:$0xff]  ;;  %v371_v4 = vld [vmem:[#allocation6 + $0xd0] sm:$0xff]  ;;  %p858_p0 = pnand %p857_p13, %p851_p10 }
  0x33   :  { %271 = vmatpush1.msra.mxu0 %v226_v47  ;;  %v138_v11 = vsel %vm45_vm0, 0.0, %v136_v5  ;;  %v370_v5 = vld [vmem:[#allocation6 + $0xc8] sm:$0xff] }
  0x34   :  { %198 = vrot.lane.b32.xlu0 %v166_v40, %s881_s0  ;;  %272 = vmatprep.subr.mxu0 %v880_v0  ;;  %v165_v40 = vld [vmem:[#allocation3 + $0x41] ss:$2 sm:$0xff] }
  0x35   :  { %202 = vrot.lane.b32.xlu1 %v167_v41, %s884_s22  ;;  %273 = vmatpush1.msra.mxu0 %v225_v48 }
  0x36   :  { %274 = vmatprep.subr.mxu0 %v880_v0 }
  0x37   :  { %275 = vmatpush1.msra.mxu0 %v224_v49 }
  0x38   :  { %206 = vrot.lane.b32.xlu0 %v168_v44, %s885_s23  ;;  %276 = vmatprep.subr.mxu0 %v880_v0 }
  0x39   :  { %194 = vrot.lane.b32.xlu1 %v164_v45, %s887_s25  ;;  %277 = vmatpush1.msra.mxu0 %v223_v50 }
  0x3a   :  { %278 = vmatprep.subr.mxu0 %v880_v0 }
  0x3b   :  { %279 = vmatpush1.msra.mxu0 %v222_v51 }
  0x3c   :  { %280 = vmatprep.subr.mxu0 %v880_v0 }
  0x3d   :  { %281 = vmatpush1.msra.mxu0 %v221_v52 }
  0x3e   :  { %282 = vmatprep.subr.mxu0 %v880_v0 }
  0x3f   :  { %283 = vmatpush1.msra.mxu0 %v220_v53 }
  0x40   :  { %284 = vmatprep.subr.mxu0 %v880_v0 }
  0x41   :  { %285 = vmatpush1.msra.mxu0 %v219_v54  ;;  %v384_v54 = vld [vmem:[#allocation6 + $0x138] sm:$0xff] }
  0x42   :  { %302 = vmatprep.subr.mxu0 %v880_v0  ;;  %402 = vmatpush1.msra.mxu1 %v384_v54  ;;  %v518_v54 = vld [vmem:[#allocation6 + $0x248] sm:$0xff] }
  0x43   :  { %303 = vmatpush2.msra.mxu0 %v242_v55  ;;  %v383_v55 = vld [vmem:[#allocation6 + $0x130] sm:$0xff]  ;;  %403 = vmatprep.subr.mxu1 %v880_v0 }
  0x44   :  { %304 = vmatprep.subr.mxu0 %v880_v0  ;;  %404 = vmatpush1.msra.mxu1 %v383_v55  ;;  %v502_v55 = vld [vmem:[#allocation6 + $0x1c8] sm:$0xff] }
  0x45   :  { %305 = vmatpush2.msra.mxu0 %v241_v56  ;;  %v382_v56 = vld [vmem:[#allocation6 + $0x128] sm:$0xff]  ;;  %405 = vmatprep.subr.mxu1 %v880_v0 }
  0x46   :  { %306 = vmatprep.subr.mxu0 %v880_v0  ;;  %406 = vmatpush1.msra.mxu1 %v382_v56  ;;  %v517_v56 = vld [vmem:[#allocation6 + $0x240] sm:$0xff] }
  0x47   :  { %307 = vmatpush2.msra.mxu0 %v240_v57  ;;  %v381_v57 = vld [vmem:[#allocation6 + $0x120] sm:$0xff]  ;;  %407 = vmatprep.subr.mxu1 %v880_v0 }
  0x48   :  { %308 = vmatprep.subr.mxu0 %v880_v0  ;;  %408 = vmatpush1.msra.mxu1 %v381_v57  ;;  %v501_v57 = vld [vmem:[#allocation6 + $0x1c0] sm:$0xff] }
  0x49   :  { %309 = vmatpush2.msra.mxu0 %v239_v58  ;;  %v380_v58 = vld [vmem:[#allocation6 + $0x118] sm:$0xff]  ;;  %409 = vmatprep.subr.mxu1 %v880_v0 }
  0x4a   :  { %310 = vmatprep.subr.mxu0 %v880_v0  ;;  %410 = vmatpush1.msra.mxu1 %v380_v58  ;;  %v516_v58 = vld [vmem:[#allocation6 + $0x238] sm:$0xff] }
  0x4b   :  { %311 = vmatpush2.msra.mxu0 %v238_v59  ;;  %v379_v59 = vld [vmem:[#allocation6 + $0x110] sm:$0xff]  ;;  %411 = vmatprep.subr.mxu1 %v880_v0 }
  0x4c   :  { %312 = vmatprep.subr.mxu0 %v880_v0  ;;  %412 = vmatpush1.msra.mxu1 %v379_v59  ;;  %v500_v59 = vld [vmem:[#allocation6 + $0x1b8] sm:$0xff] }
  0x4d   :  { %313 = vmatpush2.msra.mxu0 %v237_v60  ;;  %v378_v60 = vld [vmem:[#allocation6 + $0x108] sm:$0xff]  ;;  %413 = vmatprep.subr.mxu1 %v880_v0 }
  0x4e   :  { %314 = vmatprep.subr.mxu0 %v880_v0  ;;  %414 = vmatpush1.msra.mxu1 %v378_v60  ;;  %v515_v60 = vld [vmem:[#allocation6 + $0x230] sm:$0xff] }
  0x4f   :  { %315 = vmatpush2.msra.mxu0 %v236_v61  ;;  %v377_v61 = vld [vmem:[#allocation6 + $0x100] sm:$0xff]  ;;  %415 = vmatprep.subr.mxu1 %v880_v0 }
  0x50   :  { %316 = vmatprep.subr.mxu0 %v880_v0  ;;  %416 = vmatpush1.msra.mxu1 %v377_v61  ;;  %v499_v61 = vld [vmem:[#allocation6 + $0x1b0] sm:$0xff] }
  0x51   :  { %317 = vmatpush2.msra.mxu0 %v235_v62  ;;  %v376_v62 = vld [vmem:[#allocation6 + $0xf8] sm:$0xff]  ;;  %417 = vmatprep.subr.mxu1 %v880_v0 }
  0x52   :  { %418 = vmatpush1.msra.mxu1 %v376_v62  ;;  %v514_v62 = vld [vmem:[#allocation6 + $0x228] sm:$0xff] }
  0x53   :  { %419 = vmatprep.subr.mxu1 %v880_v0 }
  0x90   :  { %v106_v63 = vpop.permute.xlu0 %105 }
  0x91   :  { %v130_v31 = vsel %vm116_vm1, %v72_v22, %v106_v63  ;;  %v375_v63 = vld [vmem:[#allocation6 + $0xf0] sm:$0xff] }
  0x92   :  { %420 = vmatpush1.msra.mxu1 %v375_v63  ;;  %v498_v63 = vld [vmem:[#allocation6 + $0x1a8] sm:$0xff] }
  0x93   :  { %v777_v1 = vpop.permute.xlu1 %776  ;;  %421 = vmatprep.subr.mxu1 %v880_v0 }
  0x94   :  { %v778_v18 = vunpack.i.l.bf16 %v777_v1  ;;  %v779_v34 = vunpack.i.h.bf16 %v777_v1  ;;  %v374_v1 = vld [vmem:[#allocation6 + $0xe8] sm:$0xff] }
  0x95   :  { %422 = vmatpush1.msra.mxu1 %v374_v1  ;;  %v513_v1 = vld [vmem:[#allocation6 + $0x220] sm:$0xff] }
  0x96   :  { %v787_v6 = vpop.permute.xlu0 %786  ;;  %423 = vmatprep.subr.mxu1 %v880_v0 }
  0x97   :  { %v782_v7 = vpop.permute.xlu1 %781  ;;  %v788_v8 = vunpack.i.l.bf16 %v787_v6  ;;  %v789_v9 = vunpack.i.h.bf16 %v787_v6  ;;  %424 = vmatpush1.msra.mxu1 %v373_v2  ;;  %v369_v6 = vld [vmem:[#allocation6 + $0xc0] sm:$0xff] }
  0x98   :  { %v783_v23 = vunpack.i.l.bf16 %v782_v7  ;;  %v784_v42 = vunpack.i.h.bf16 %v782_v7  ;;  %425 = vmatprep.subr.mxu1 %v880_v0  ;;  %v392_v7 = vld [vmem:[#allocation6 + $0x178] sm:$0xff]  ;;  %v497_v2 = vld [vmem:[#allocation6 + $0x1a0] sm:$0xff] }
  0x99   :  { %v117_v17 = vsel %vm116_vm1, %v46_v10, %v788_v8  ;;  %v209_v19 = vsel %vm116_vm1, %v138_v11, %v789_v9  ;;  %426 = vmatpush1.msra.mxu1 %v372_v3  ;;  %v391_v8 = vld [vmem:[#allocation6 + $0x170] sm:$0xff]  ;;  %v702_v9 = vld [vmem:[#allocation6 + $0x2a0] ss:$0 sm:$0xff]  ;;  %v390_v11 = vld [vmem:[#allocation6 + $0x168] sm:$0xff] }
  0x9a   :  { %v792_v12 = vpop.permute.xlu0 %791  ;;  %427 = vmatprep.subr.mxu1 %v880_v0  ;;  %v512_v3 = vld [vmem:[#allocation6 + $0x218] sm:$0xff] }
  0x9b   :  { %v797_v13 = vpop.permute.xlu1 %796  ;;  %v794_v14 = vunpack.i.h.bf16 %v792_v12  ;;  %v793_v15 = vunpack.i.l.bf16 %v792_v12  ;;  %428 = vmatpush1.msra.mxu1 %v371_v4  ;;  %v389_v12 = vld [vmem:[#allocation6 + $0x160] sm:$0xff]  ;;  %v496_v4 = vld [vmem:[#allocation6 + $0x198] sm:$0xff] }
  0x9c   :  { %v798_v16 = vunpack.i.l.bf16 %v797_v13  ;;  %v799_v21 = vunpack.i.h.bf16 %v797_v13  ;;  %429 = vmatprep.subr.mxu1 %v880_v0 }
  0x9d   :  { %v119_v20 = vsel %vm118_vm2, %v117_v17, %v793_v15  ;;  %v210_v24 = vsel %vm118_vm2, %v209_v19, %v794_v14  ;;  %430 = vmatpush1.msra.mxu1 %v370_v5  ;;  %v388_v15 = vld [vmem:[#allocation6 + $0x158] sm:$0xff]  ;;  %v387_v17 = vld [vmem:[#allocation6 + $0x150] sm:$0xff] }
  0x9e   :  { %v110_v25 = vpop.permute.xlu0 %109  ;;  %v121_v27 = vsel %vm120_vm3, %v119_v20, %v798_v16  ;;  %v211_v32 = vsel %vm120_vm3, %v210_v24, %v799_v21  ;;  %431 = vmatprep.subr.mxu1 %v880_v0  ;;  %v386_v20 = vld [vmem:[#allocation6 + $0x148] sm:$0xff]  ;;  %v385_v21 = vld [vmem:[#allocation6 + $0x140] sm:$0xff]  ;;  %v511_v5 = vld [vmem:[#allocation6 + $0x210] sm:$0xff] }
  0x9f   :  { %v802_v26 = vpop.permute.xlu1 %801  ;;  %v123_v29 = vsel %vm122_vm4, %v121_v27, %v778_v18  ;;  %v131_v35 = vsel %vm118_vm2, %v130_v31, %v110_v25  ;;  %v212_v41 = vsel %vm122_vm4, %v211_v32, %v779_v34  ;;  %432 = vmatpush1.msra.mxu1 %v369_v6  ;;  %v705_v6 = vld [vmem:[#allocation6 + $0x2a1] ss:$0 sm:$0xff] }
  0xa0   :  { %v803_v28 = vunpack.i.l.bf16 %v802_v26  ;;  %v125_v30 = vsel %vm124_vm5, %v123_v29, %v783_v23  ;;  %v804_v43 = vunpack.i.h.bf16 %v802_v26  ;;  %v213_v47 = vsel %vm124_vm5, %v212_v41, %v784_v42  ;;  %449 = vmatprep.subr.mxu1 %v880_v0  ;;  %v524_v42 = vld [vmem:[#allocation6 + $0x278] sm:$0xff] }
  0xa1   :  { %450 = vmatpush2.msra.mxu1 %v392_v7  ;;  %710 = vmatprep.subr.mxu0 %v524_v42  ;;  %v495_v7 = vld [vmem:[#allocation6 + $0x190] sm:$0xff] }
  0xa2   :  { %v127_v33 = vsel %vm126_vm6, %v125_v30, %v803_v28  ;;  %v114_v36 = vpop.permute.xlu0 %113  ;;  %v214_v51 = vsel %vm126_vm6, %v213_v47, %v804_v43  ;;  %451 = vmatprep.subr.mxu1 %v880_v0  ;;  %v508_v43 = vld [vmem:[#allocation6 + $0x1f8] sm:$0xff]  ;;  %v506_v47 = vld [vmem:[#allocation6 + $0x1e8] sm:$0xff] }
  0xa3   :  { %v102_v37 = vpop.permute.xlu1 %101  ;;  %v132_v38 = vsel %vm120_vm3, %v131_v35, %v114_v36  ;;  %452 = vmatpush2.msra.mxu1 %v391_v8  ;;  %v510_v8 = vld [vmem:[#allocation6 + $0x208] sm:$0xff] }
  0xa4   :  { %v129_v39 = vsel %vm128_vm7, %v127_v33, %v102_v37  ;;  %703 = vmatprep.mubr.msk.f32.mxu0 %vm122_vm4, %v132_v38  ;;  %453 = vmatprep.subr.mxu1 %v880_v0 }
  0xa5   :  { %319 = vmatmul.mubr.f32.vlgmr.msra.gmra.mxu0 %v129_v39  ;;  %454 = vmatpush2.msra.mxu1 %v390_v11 }
  0xa6   :  { %v199_v44 = vpop.permute.xlu0 %198  ;;  %455 = vmatprep.subr.mxu1 %v880_v0  ;;  %711 = vmatpush3.msra.mxu0 %v508_v43 }
  0xa7   :  { %v203_v45 = vpop.permute.xlu1 %202  ;;  %v216_v46 = vsel %vm116_vm1, %v165_v40, %v199_v44  ;;  %456 = vmatpush2.msra.mxu1 %v389_v12  ;;  %v523_v44 = vld [vmem:[#allocation6 + $0x270] sm:$0xff]  ;;  %v493_v12 = vld [vmem:[#allocation6 + $0x180] sm:$0xff] }
  0xa8   :  { %v217_v48 = vsel %vm118_vm2, %v216_v46, %v203_v45  ;;  %457 = vmatprep.subr.mxu1 %v880_v0  ;;  %v507_v45 = vld [vmem:[#allocation6 + $0x1f0] sm:$0xff]  ;;  %v522_v46 = vld [vmem:[#allocation6 + $0x268] sm:$0xff]  ;;  %712 = vmatprep.subr.mxu0 %v523_v44 }
  0xa9   :  { %458 = vmatpush2.msra.mxu1 %v388_v15  ;;  %713 = vmatpush3.msra.mxu0 %v507_v45 }
  0xaa   :  { %v207_v49 = vpop.permute.xlu0 %206  ;;  %459 = vmatprep.subr.mxu1 %v880_v0  ;;  %714 = vmatprep.subr.mxu0 %v522_v46 }
  0xab   :  { %v195_v50 = vpop.permute.xlu1 %194  ;;  %v218_v52 = vsel %vm120_vm3, %v217_v48, %v207_v49  ;;  %460 = vmatpush2.msra.mxu1 %v387_v17  ;;  %v521_v48 = vld [vmem:[#allocation6 + $0x260] sm:$0xff]  ;;  %715 = vmatpush3.msra.mxu0 %v506_v47 }
  0xac   :  { %v215_v53 = vsel %vm128_vm7, %v214_v51, %v195_v50  ;;  %704 = vmatprep.mubr.msk.f32.mxu0 %vm122_vm4, %v218_v52  ;;  %461 = vmatprep.subr.mxu1 %v880_v0  ;;  %v505_v49 = vld [vmem:[#allocation6 + $0x1e0] sm:$0xff]  ;;  %v520_v50 = vld [vmem:[#allocation6 + $0x258] sm:$0xff]  ;;  %v519_v52 = vld [vmem:[#allocation6 + $0x250] sm:$0xff] }
  0xad   :  { %324 = vmatmul.mubr.f32.gmra.mxu0 %v215_v53  ;;  %462 = vmatpush2.msra.mxu1 %v386_v20  ;;  %v504_v51 = vld [vmem:[#allocation6 + $0x1d8] sm:$0xff]  ;;  %v503_v53 = vld [vmem:[#allocation6 + $0x1d0] sm:$0xff] }
  0xae   :  { %463 = vmatprep.subr.mxu1 %v880_v0  ;;  %716 = vmatprep.subr.mxu0 %v521_v48 }
  0xaf   :  { %464 = vmatpush2.msra.mxu1 %v385_v21  ;;  %717 = vmatpush3.msra.mxu0 %v505_v49 }
  0xb0   :  { %750 = vmatprep.subr.mxu1 %v880_v0  ;;  %718 = vmatprep.subr.mxu0 %v520_v50 }
  0xb1   :  { %719 = vmatpush3.msra.mxu0 %v504_v51 }
  0xb2   :  { %720 = vmatprep.subr.mxu0 %v519_v52 }
  0xb3   :  { %721 = vmatpush3.msra.mxu0 %v503_v53 }
  0xb4   :  { %722 = vmatprep.subr.mxu0 %v518_v54 }
  0xb5   :  { %723 = vmatpush3.msra.mxu0 %v502_v55 }
  0xb6   :  { %724 = vmatprep.subr.mxu0 %v517_v56 }
  0xb7   :  { %725 = vmatpush3.msra.mxu0 %v501_v57 }
  0xb8   :  { %726 = vmatprep.subr.mxu0 %v516_v58 }
  0xb9   :  { %727 = vmatpush3.msra.mxu0 %v500_v59 }
  0xba   :  { %728 = vmatprep.subr.mxu0 %v515_v60 }
  0xbb   :  { %729 = vmatpush3.msra.mxu0 %v499_v61 }
  0xbc   :  { %730 = vmatprep.subr.mxu0 %v514_v62 }
  0xbd   :  { %731 = vmatpush3.msra.mxu0 %v498_v63 }
  0xbe   :  { %732 = vmatprep.subr.mxu0 %v513_v1 }
  0xbf   :  { %733 = vmatpush3.msra.mxu0 %v497_v2 }
  0xc0   :  { %734 = vmatprep.subr.mxu0 %v512_v3 }
  0xc1   :  { %735 = vmatpush3.msra.mxu0 %v496_v4 }
  0xc2   :  { %736 = vmatprep.subr.mxu0 %v511_v5 }
  0xc3   :  { %737 = vmatpush3.msra.mxu0 %v495_v7 }
  0xc4   :  { %738 = vmatprep.subr.mxu0 %v510_v8 }
 0x165   :  { %v320_v10 = vpop.f32.mrf.mxu0 }
 0x166   :  { %v321_v13 = vadd.f32 %v702_v9, %v320_v10  ;;  %v509_v10 = vld [vmem:[#allocation6 + $0x200] sm:$0xff] }
 0x167   :  { %v322_v14 = vpop.f32.mrf.mxu0 }
 0x168   :  { %v329_v16 = vmax.f32 %v321_v13, 0.0 }
 0x16a   :  { %331 = vst.msk [vmem:[#allocation2] sm:$0xff] %vm122_vm4, %v329_v16 }
 0x16d   :  { %v325_v18 = vpop.f32.mrf.mxu0 }
 0x16e   :  { %v326_v19 = vadd.f32 %v702_v9, %v325_v18  ;;  %v494_v9 = vld [vmem:[#allocation6 + $0x188] sm:$0xff] }
 0x16f   :  { %v327_v22 = vpop.f32.mrf.mxu0  ;;  %739 = vmatpush3.msra.mxu0 %v494_v9 }
 0x170   :  { %v330_v23 = vmax.f32 %v326_v19, 0.0  ;;  %740 = vmatprep.subr.mxu0 %v509_v10 }
 0x171   :  { %v339_v24 = vld [vmem:[#allocation2] ss:$2 sm:$0xf]  ;;  %v340_v28 = vld [vmem:[#allocation2 + $0x1] ss:$2 sm:$0xf]  ;;  %741 = vmatpush3.msra.mxu0 %v493_v12 }
 0x172   :  { %332 = vst.msk [vmem:[#allocation2 + $0x8] sm:$0xff] %vm122_vm4, %v330_v23  ;;  %342 = vrot.lane.b32.xlu1 %v339_v24, %s882_s1  ;;  %v334_v31 = vld [vmem:[#allocation2 + $0x1] ss:$2 sm:$0x7] }
 0x173   :  { %v336_v33 = vrot.slane %v334_v31, 7  ;;  %v602_v31 = vld [vmem:[#allocation6 + $0x288] sm:$0xff] }
 0x175   :  { %v338_v38 = vsel %vm45_vm0, 0.0, %v336_v33 }
 0x179   :  { %v353_v25 = vld [vmem:[#allocation2 + $0x8] ss:$2 sm:$0xf]  ;;  %v354_v26 = vld [vmem:[#allocation2 + $0x9] ss:$2 sm:$0xf] }
 0x17a   :  { %356 = vrot.lane.b32.xlu0 %v353_v25, %s882_s1  ;;  %v363_v27 = vrot.slane %v354_v26, 4  ;;  %v347_v30 = vld [vmem:[#allocation2 + $0x9] ss:$2 sm:$0x7] }
 0x17b   :  { %v349_v32 = vrot.slane %v347_v30, 7  ;;  %v603_v30 = vld [vmem:[#allocation6 + $0x290] sm:$0xff] }
 0x17c   :  { %v368_v29 = vsel %vm366_vm8, %v340_v28, %v363_v27 }
 0x17d   :  { %706 = vmatprep.mubr.msk.f32.mxu1 %vm122_vm4, %v368_v29  ;;  %v351_v36 = vsel %vm45_vm0, 0.0, %v349_v32  ;;  %v604_v29 = vld [vmem:[#allocation6 + $0x298] sm:$0xff]  ;;  %v601_v32 = vld [vmem:[#allocation6 + $0x280] sm:$0xff] }
 0x1e4   :  { %v343_v34 = vpop.permute.xlu1 %342 }
 0x1e5   :  { %v345_v40 = vsel %vm122_vm4, %v338_v38, %v343_v34  ;;  %v707_v34 = vld [vmem:[#allocation6 + $0x2a2] ss:$0 sm:$0xff] }
 0x1ec   :  { %v357_v35 = vpop.permute.xlu0 %356 }
 0x1ed   :  { %v359_v37 = vsel %vm122_vm4, %v351_v36, %v357_v35 }
 0x1ee   :  { %v362_v39 = vrot.slane %v359_v37, 4 }
 0x1f0   :  { %v367_v41 = vsel %vm366_vm8, %v345_v40, %v362_v39  ;;  %v708_v39 = vld [vmem:[#allocation6 + $0x2a3] ss:$0 sm:$0xff] }
 0x1f1   :  { %466 = vmatmul.mubr.f32.vlgmr.msra.gmra.mxu1 %v367_v41 }
 0x1f2   :  { %751 = vmatpush3.msra.mxu1 %v604_v29  ;;  %758 = vmatprep.mubr.msk.f32.mxu1 %vm888_vm9, %v880_v0 }
 0x1f3   :  { %752 = vmatprep.subr.mxu1 %v880_v0 }
 0x1f4   :  { %753 = vmatpush3.msra.mxu1 %v603_v30 }
 0x1f5   :  { %754 = vmatprep.subr.mxu1 %v880_v0 }
 0x1f6   :  { %755 = vmatpush3.msra.mxu1 %v602_v31 }
 0x1f7   :  { %756 = vmatprep.subr.mxu1 %v880_v0 }
 0x1f8   :  { %757 = vmatpush3.msra.mxu1 %v601_v32 }
 0x2b1   :  { %v467_v11 = vpop.f32.mrf.mxu1 }
 0x2b2   :  { %v468_v13 = vadd.f32 %v705_v6, %v467_v11 }
 0x2b3   :  { %v469_v14 = vpop.f32.mrf.mxu1 }
 0x2b4   :  { %v471_v15 = vmax.f32 %v468_v13, 0.0 }
 0x2b6   :  { %v473_v16 = vrot.slane %v471_v15, 1  ;;  %v479_v17 = vrot.slane %v471_v15, 3  ;;  %v477_v22 = vrot.slane %v471_v15, 2 }
 0x2b8   :  { %v805_v18 = vpack.i.bf16 %v473_v16, %v479_v17 }
 0x2ba   :  { %806 = vrot.lane.b32.xlu0 %v805_v18, %s882_s1 }
 0x32c   :  { %v807_v19 = vpop.permute.xlu0 %806 }
 0x32d   :  { %v809_v20 = vunpack.i.h.bf16 %v807_v19  ;;  %v808_v21 = vunpack.i.l.bf16 %v807_v19 }
 0x32f   :  { %v483_v23 = vsel %vm122_vm4, %v471_v15, %v809_v20  ;;  %v484_v24 = vsel %vm122_vm4, %v477_v22, %v808_v21 }
 0x330   :  { %v487_v25 = vrot.slane %v483_v23, 3  ;;  %v488_v26 = vrot.slane %v484_v24, 3 }
 0x332   :  { %v492_v27 = vsel %vm45_vm0, %v484_v24, %v488_v26  ;;  %v491_v28 = vsel %vm45_vm0, %v483_v23, %v487_v25 }
 0x333   :  { %594 = vmatprep.mubr.f32.mxu0 %v492_v27 }
 0x334   :  { %595 = vmatmul.mubr.f32.vlgmr.msra.gmra.mxu0 %v491_v28 }
 0x3f4   :  { %v742_v33 = vpop.f32.mrf.mxu0 }
 0x3f6   :  { %v743_v35 = vpop.f32.mrf.mxu0 }
 0x3f7   :  { %v744_v36 = vadd.f32 %v743_v35, %v742_v33 }
 0x3f9   :  { %v597_v37 = vadd.f32 %v744_v36, %v707_v34 }
 0x3fb   :  { %v600_v38 = vmax.f32 %v597_v37, 0.0 }
 0x3fd   :  { %759 = vmatmul.mubr.msk.f32.vlgmr.msra.gmra.mxu1 %vm118_vm2, %v600_v38 }
 0x4bd   :  { %v679_v40 = vpop.f32.mrf.mxu1 }
 0x4be   :  { %v680_v41 = vadd.f32 %v708_v39, %v679_v40 }
 0x4bf   :  { %v760_v42 = vpop.f32.mrf.mxu1 }
 0x4c0   :  { %v683_v43 = vmax.f32 %v680_v41, 0.0 }
 0x4c2   :  { %685 = vst.msk [vmem:[#allocation8] sm:$0x3] %vm684_vm10, %v683_v43 }
 0x4c3   :  { %861 = shalt.err (!%p858_p0)
}
 0x4c4   :  { %695 = dma.vmem_to_hbm [thread:$0]  %s693_s27, 32, %s1026_s2, [#allocation5]  }
 0x4c5   :  { %874 = dma.done.wait [#allocation5], 32  }
 0x4c6   :  { %875 = vsyncadd [#allocation5], 4294967264 }
 0x4c7   :  { %699 = vsyncpa [#allocation4], 1 }
 0x4c8   :  { %700 = vsyncpa [#allocation7], 1 }
 0x4c9   :  { %701 = vsyncpa [#allocation5], 1 }

</bundles_post_ra>
